<compile_context>
chip_gen: v7x
topology: tpu7x:2x2x1
jax: 0.10.0
libtpu: 0.0.40
codegen_flags: <defaults>
</compile_context>

<pallas_src>
import functools
from typing import NamedTuple

import jax
import jax.numpy as jnp
from jax import lax
from jax.experimental import pallas as pl
from jax.experimental.pallas import tpu as pltpu


def _round_up(n, m):
    return ((n + m - 1) // m) * m


class PackedPolicyParams(NamedTuple):
    w1: jax.Array       # (n_obs, hidden)          bf16
    w_heads: jax.Array  # (hidden, out_lanes)      bf16, [Wa | Wv | 0-pad]
    b_all: jax.Array    # (1, hidden + out_lanes)  f32,  [b1 | ba | bv | 0-pad]
    n_actions: int


def prepare_params(params):
    """One-time param packing (hoisted out of the per-step forward call)."""
    w1, b1, wa, ba, wv, bv = params
    hidden = w1.shape[1]
    n_actions = wa.shape[1]
    n_out = n_actions + 1
    out_lanes = _round_up(n_out, 128)          # lane-dense fused head width
    pad = out_lanes - n_out
    zeros_w = jnp.zeros((hidden, pad), jnp.float32)
    zeros_b = jnp.zeros((1, pad), jnp.float32)
    w_heads = jnp.concatenate([wa, wv, zeros_w], axis=1)       # (hidden, out_lanes)
    b_heads = jnp.concatenate([ba, bv, zeros_b], axis=1)       # (1, out_lanes)
    b_all = jnp.concatenate([b1, b_heads], axis=1)             # (1, hidden+out_lanes)
    return PackedPolicyParams(
        w1=w1.astype(jnp.bfloat16),
        w_heads=w_heads.astype(jnp.bfloat16),
        b_all=b_all.astype(jnp.float32),
        n_actions=int(n_actions),
    )


def policy_kernel(x_ref, w1_ref, wh_ref, b_ref, out_ref, *, n_actions):
    hidden = w1_ref.shape[1]          # 128
    wide = wh_ref.shape[1]            # out_lanes (>= n_actions + 1, padded to 128)

    x = x_ref[...]
    if x.dtype != jnp.bfloat16:       # static check; wrapper already casts
        x = x.astype(jnp.bfloat16)

    # packed biases [b1 | ba | bv | 0] -> one DMA, static slices at a lane boundary
    b1 = b_ref[:, :hidden]                                     # (1, 128) f32
    bh = b_ref[:, hidden:]                                     # (1, wide) f32

    # affine1 + ReLU: bf16 MXU, f32 accumulate, f32 elementwise
    h = jnp.dot(x, w1_ref[...], preferred_element_type=jnp.float32) + b1
    h = jnp.maximum(h, 0.0)                                    # (Bt, 128) f32

    # fused (and lane-padded) heads: one full-width MXU pass -> [logits | value | 0]
    z = jnp.dot(h.astype(jnp.bfloat16), wh_ref[...],
                preferred_element_type=jnp.float32) + bh       # (Bt, wide) f32

    # numerically-stable softmax over the logit columns only; value column and
    # zero-padded columns are masked out of the reduction and passed through.
    col = lax.broadcasted_iota(jnp.int32, z.shape, 1)
    is_logit = col < n_actions
    masked = jnp.where(is_logit, z, jnp.float32(-1e30))
    m = jnp.max(masked, axis=-1, keepdims=True)
    e = jnp.exp(masked - m)                                    # non-logit columns -> 0
    denom = jnp.sum(e, axis=-1, keepdims=True)
    probs = e / denom                                          # exact divide (RL log-probs)

    full = jnp.where(is_logit, probs, z)                       # [probs | value | 0-pad]
    n_store = out_ref.shape[1]
    if n_store == wide:
        out_ref[...] = full.astype(out_ref.dtype)              # lane-dense store
    else:
        out_ref[...] = full[:, :n_store].astype(out_ref.dtype) # compact (large-B) path


def policy_forward(x, packed, *, block_b=1024):
    """x: (B, n_obs) float. Returns (action_prob (B, n_actions), state_values (B, 1))."""
    w1, w_heads, b_all, n_actions = packed
    B, n_obs = x.shape
    hidden = w1.shape[1]
    out_lanes = w_heads.shape[1]
    n_out = n_actions + 1

    # bf16 input stream halves x DMA bytes and doubles MXU rate (accumulate stays f32).
    if x.dtype != jnp.bfloat16:
        x = x.astype(jnp.bfloat16)

    # ---- batch tiling ----
    bp8 = _round_up(B, 8)
    bb = min(block_b, bp8)
    if bp8 > 256:
        # v7x megacore: make sure the parallel grid has >= 2 steps.
        bb = min(bb, _round_up((bp8 + 1) // 2, 8))
    num_blocks = -(-bp8 // bb)
    bb = _round_up(-(-bp8 // num_blocks), 8)     # re-balance: padding waste <= a few rows
    bp = bb * num_blocks
    if bp != B:
        x = jnp.pad(x, ((0, bp - B), (0, 0)))

    # Lane-dense padded output for the latency path; compact output when the
    # padded writeback (512 B/row) would dominate the HBM stream.
    n_store = out_lanes if B <= 4096 else n_out

    kernel = functools.partial(policy_kernel, n_actions=n_actions)

    combined = pl.pallas_call(
        kernel,
        out_shape=jax.ShapeDtypeStruct((bp, n_store), jnp.float32),
        grid_spec=pltpu.PrefetchScalarGridSpec(
            num_scalar_prefetch=0,
            grid=(num_blocks,),
            in_specs=[
                pl.BlockSpec((bb, n_obs), lambda i: (i, 0)),               # x: batch-tiled
                pl.BlockSpec((n_obs, hidden), lambda i: (0, 0)),           # W1 (bf16): resident
                pl.BlockSpec((hidden, out_lanes), lambda i: (0, 0)),       # [Wa|Wv|0] (bf16)
                pl.BlockSpec((1, hidden + out_lanes), lambda i: (0, 0)),   # packed biases (f32)
            ],
            out_specs=pl.BlockSpec((bb, n_store), lambda i: (i, 0)),
        ),
        compiler_params=pltpu.CompilerParams(
            dimension_semantics=("parallel",)),
    )(x, w1, w_heads, b_all)

    probs = combined[:B, :n_actions]
    values = combined[:B, n_actions:n_out]
    return probs, values


def init_params(key, n_observations, n_actions, hidden=128):
    """Deterministic init mimicking nn.Linear default (uniform(-1/sqrt(fan_in), 1/sqrt(fan_in)))."""
    ks = jax.random.split(key, 6)

    def lin(kw, kb, fan_in, fan_out):
        bound = 1.0 / jnp.sqrt(jnp.float32(fan_in))
        w = jax.random.uniform(kw, (fan_in, fan_out), jnp.float32, -bound, bound)
        b = jax.random.uniform(kb, (1, fan_out), jnp.float32, -bound, bound)
        return w, b

    w1, b1 = lin(ks[0], ks[1], n_observations, hidden)
    wa, ba = lin(ks[2], ks[3], hidden, n_actions)
    wv, bv = lin(ks[4], ks[5], hidden, 1)
    return (w1, b1, wa, ba, wv, bv)


def policy_forward_ref(x, params, *, mxu_dtype=jnp.float32):
    """Plain-JAX reference. mxu_dtype=bf16 replicates the kernel's MXU input precision."""
    w1, b1, wa, ba, wv, bv = params
    xm = x.astype(mxu_dtype)
    h = jnp.dot(xm, w1.astype(mxu_dtype), preferred_element_type=jnp.float32) + b1
    h = jnp.maximum(h, 0.0)
    hm = h.astype(mxu_dtype)
    logits = jnp.dot(hm, wa.astype(mxu_dtype), preferred_element_type=jnp.float32) + ba
    probs = jax.nn.softmax(logits, axis=-1)
    values = jnp.dot(hm, wv.astype(mxu_dtype), preferred_element_type=jnp.float32) + bv
    return probs, values


if __name__ == "__main__":
    key = jax.random.PRNGKey(0)
    k_param, k_x1, k_x2 = jax.random.split(key, 3)

    n_observations = 32
    n_actions = 8

    params = init_params(k_param, n_observations, n_actions)
    packed = prepare_params(params)   # one-time packing, reused across forward calls

    ok = True
    for batch, k_x in ((8, k_x1), (300, k_x2)):   # small (1 tile) and multi-tile/padded
        x = jax.random.normal(k_x, (batch, n_observations), jnp.float32)

        probs, values = policy_forward(x, packed)
        jax.block_until_ready((probs, values))

        assert probs.shape == (batch, n_actions)
        assert values.shape == (batch, 1)

        # tight check against a bf16-MXU reference (same precision as the kernel)
        probs_b, values_b = policy_forward_ref(x, params, mxu_dtype=jnp.bfloat16)
        ok &= bool(jnp.allclose(probs, probs_b, atol=2e-3))
        ok &= bool(jnp.allclose(values, values_b, atol=2e-3))

        # loose check against the full-f32 PyTorch-equivalent reference
        probs_f, values_f = policy_forward_ref(x, params, mxu_dtype=jnp.float32)
        ok &= bool(jnp.allclose(probs, probs_f, atol=2e-2))
        ok &= bool(jnp.allclose(values, values_f, atol=2e-2))

        # exact divide -> probabilities sum to 1 up to f32 rounding
        ok &= bool(jnp.allclose(jnp.sum(probs, axis=-1), 1.0, atol=1e-4))

    assert ok
    print("KERNEL_OK")
</pallas_src>

<mosaic_0001>
module attributes {stable_mosaic.version = 11 : i64} {
  func.func @policy_kernel(%arg0: i32, %arg1: memref<8x32xbf16, #tpu.memory_space<vmem>>, %arg2: memref<32x128xbf16, #tpu.memory_space<vmem>>, %arg3: memref<128x128xbf16, #tpu.memory_space<vmem>>, %arg4: memref<1x256xf32, #tpu.memory_space<vmem>>, %arg5: memref<8x128xf32, #tpu.memory_space<vmem>>) attributes {dimension_semantics = [#tpu.dimension_semantics<parallel>], iteration_bounds = array<i64: 1>, scalar_prefetch = 0 : i64, scratch_operands = 0 : i64, tpu.core_type = #tpu.core_type<tc>, window_params = [{transform_indices = @transform_0, window_bounds = array<i64: 8, 32>}, {pipeline_mode = #tpu.pipeline_mode<synchronous>, transform_indices = @transform_1, window_bounds = array<i64: 32, 128>}, {pipeline_mode = #tpu.pipeline_mode<synchronous>, transform_indices = @transform_2, window_bounds = array<i64: 128, 128>}, {pipeline_mode = #tpu.pipeline_mode<synchronous>, transform_indices = @transform_3, window_bounds = array<i64: 1, 256>}, {transform_indices = @transform_4, window_bounds = array<i64: 8, 128>}]} {
    %c0 = arith.constant 0 : index
    %c0_0 = arith.constant 0 : index
    %0 = vector.load %arg1[%c0, %c0_0] : memref<8x32xbf16, #tpu.memory_space<vmem>>, vector<8x32xbf16>
    %c0_1 = arith.constant 0 : index
    %c0_2 = arith.constant 0 : index
    %1 = vector.load %arg4[%c0_1, %c0_2] : memref<1x256xf32, #tpu.memory_space<vmem>>, vector<1x128xf32>
    %c0_3 = arith.constant 0 : index
    %c128 = arith.constant 128 : index
    %2 = vector.load %arg4[%c0_3, %c128] : memref<1x256xf32, #tpu.memory_space<vmem>>, vector<1x128xf32>
    %c0_4 = arith.constant 0 : index
    %c0_5 = arith.constant 0 : index
    %3 = vector.load %arg2[%c0_4, %c0_5] : memref<32x128xbf16, #tpu.memory_space<vmem>>, vector<32x128xbf16>
    %cst = arith.constant dense<0.000000e+00> : vector<8x128xf32>
    %4 = tpu.matmul %0, %3, %cst {dimension_numbers = #tpu.dot_dimension_numbers<[1], [0], [0], [1], [0, 0, 1, 1], [], []>} : vector<8x32xbf16>, vector<32x128xbf16>, vector<8x128xf32> -> vector<8x128xf32>
    %5 = vector.broadcast %1 : vector<1x128xf32> to vector<8x128xf32>
    %6 = arith.addf %4, %5 : vector<8x128xf32>
    %cst_6 = arith.constant 0.000000e+00 : f32
    %7 = vector.broadcast %cst_6 : f32 to vector<8x128xf32>
    %8 = arith.maximumf %6, %7 : vector<8x128xf32>
    %9 = arith.truncf %8 : vector<8x128xf32> to vector<8x128xbf16>
    %c0_7 = arith.constant 0 : index
    %c0_8 = arith.constant 0 : index
    %10 = vector.load %arg3[%c0_7, %c0_8] : memref<128x128xbf16, #tpu.memory_space<vmem>>, vector<128x128xbf16>
    %cst_9 = arith.constant dense<0.000000e+00> : vector<8x128xf32>
    %11 = tpu.matmul %9, %10, %cst_9 {dimension_numbers = #tpu.dot_dimension_numbers<[1], [0], [0], [1], [0, 0, 1, 1], [], []>} : vector<8x128xbf16>, vector<128x128xbf16>, vector<8x128xf32> -> vector<8x128xf32>
    %12 = vector.broadcast %2 : vector<1x128xf32> to vector<8x128xf32>
    %13 = arith.addf %11, %12 : vector<8x128xf32>
    %14 = tpu.iota {dimensions = array<i32: 1>} : vector<8x128xi32>
    %c8_i32 = arith.constant 8 : i32
    %15 = vector.broadcast %c8_i32 : i32 to vector<8x128xi32>
    %16 = arith.cmpi slt, %14, %15 : vector<8x128xi32>
    %cst_10 = arith.constant -1.000000e+30 : f32
    %17 = vector.broadcast %cst_10 : f32 to vector<8x128xf32>
    %18 = arith.select %16, %13, %17 : vector<8x128xi1>, vector<8x128xf32>
    %cst_11 = arith.constant dense<0xFF800000> : vector<8xf32>
    %19 = vector.multi_reduction <maximumf>, %18, %cst_11 [1] : vector<8x128xf32> to vector<8xf32>
    %20 = vector.shape_cast %19 : vector<8xf32> to vector<8x1xf32>
    %21 = vector.broadcast %20 : vector<8x1xf32> to vector<8x128xf32>
    %22 = arith.subf %18, %21 : vector<8x128xf32>
    %23 = math.exp %22 : vector<8x128xf32>
    %cst_12 = arith.constant dense<0.000000e+00> : vector<8xf32>
    %24 = vector.multi_reduction <add>, %23, %cst_12 [1] : vector<8x128xf32> to vector<8xf32>
    %25 = vector.shape_cast %24 : vector<8xf32> to vector<8x1xf32>
    %26 = vector.broadcast %25 : vector<8x1xf32> to vector<8x128xf32>
    %27 = arith.divf %23, %26 : vector<8x128xf32>
    %28 = arith.select %16, %27, %13 : vector<8x128xi1>, vector<8x128xf32>
    %c0_13 = arith.constant 0 : index
    %c0_14 = arith.constant 0 : index
    %29 = vector.load %arg5[%c0_13, %c0_14] : memref<8x128xf32, #tpu.memory_space<vmem>>, vector<8x128xf32>
    tpu.vector_store %arg5[%c0_13, %c0_14], %28 {strides = array<i32>} : memref<8x128xf32, #tpu.memory_space<vmem>>, vector<8x128xf32>,
    return
  }
  func.func @transform_0(%arg0: i32) -> (i32, i32) {
    %c0_i32 = arith.constant 0 : i32
    %c0_i32_0 = arith.constant 0 : i32
    return %arg0, %c0_i32 : i32, i32
  }
  func.func @transform_1(%arg0: i32) -> (i32, i32) {
    %c0_i32 = arith.constant 0 : i32
    %c0_i32_0 = arith.constant 0 : i32
    %c0_i32_1 = arith.constant 0 : i32
    return %c0_i32, %c0_i32_0 : i32, i32
  }
  func.func @transform_2(%arg0: i32) -> (i32, i32) {
    %c0_i32 = arith.constant 0 : i32
    %c0_i32_0 = arith.constant 0 : i32
    %c0_i32_1 = arith.constant 0 : i32
    return %c0_i32, %c0_i32_0 : i32, i32
  }
  func.func @transform_3(%arg0: i32) -> (i32, i32) {
    %c0_i32 = arith.constant 0 : i32
    %c0_i32_0 = arith.constant 0 : i32
    %c0_i32_1 = arith.constant 0 : i32
    return %c0_i32, %c0_i32_0 : i32, i32
  }
  func.func @transform_4(%arg0: i32) -> (i32, i32) {
    %c0_i32 = arith.constant 0 : i32
    %c0_i32_0 = arith.constant 0 : i32
    return %arg0, %c0_i32 : i32, i32
  }
}

</mosaic_0001>

<bundles_post_ra>
// kernel: tpu_custom_call.1
= control target key start
LH: loop header
LB: loop body
LE: loop exit
PB: predicated region body
PF: predicated region fallthrough
CT: control target
= control target key end

     0   :  { %9 = vsyncpa [#allocation3], 0  ;;  %s534_s0 = inlined_call_operand.hbm [shape: bf16[8,32], index: 0, kind: input, shape index: {}]   ;;  %s535_s1 = inlined_call_operand.hbm [shape: bf16[32,128], index: 1, kind: input, shape index: {}]   ;;  %s536_s2 = inlined_call_operand.hbm [shape: bf16[128,128], index: 2, kind: input, shape index: {}]   ;;  %s537_s3 = inlined_call_operand.vmem [shape: f32[1,256], index: 3, kind: input, shape index: {}]   ;;  %s538_s4 = inlined_call_operand.hbm [shape: f32[8,128], index: 4, kind: output, shape index: {}]  }
   0x1   :  { %10 = vsyncpa [#allocation6], 0 }
   0x2   :  { %11 = vsyncpa [#allocation4], 0  ;;  %s439_s15 = smov [#allocation5]   ;;  %s345_s19 = scalar_lea.hbm %s535_s1, 256 }
   0x3   :  { %s27_s16 = sshll.u32 %s439_s15, 4  ;;  %p346_p0 = scmp.ne.s32.totalorder %s535_s1, %s345_s19  ;;  %s28_s16 = int_to_ptr.vmem [resolvable:$true] %s27_s16 }
   0x4   :  { %p349_p1 = scmp.lt.u32.totalorder %s345_s19, %s535_s1 }
   0x6   :  { %p351_p2 = pnand %p349_p1, %p346_p0 }
   0x8   :  { %354 = shalt.err (!%p351_p2)
}
   0x9   :  { %s355_s24 = scalar_lea.vmem %s28_s16, 256  ;;  %p360_p4 = scmp.lt.s32.totalorder %s28_s16, %s28_s16 }
   0xa   :  { %p356_p3 = scmp.ne.s32.totalorder %s28_s16, %s355_s24  ;;  %p361_p5 = scmp.lt.s32.totalorder %s355_s24, %s355_s24 }
   0xc   :  { %p362_p6 = por %p361_p5, %p360_p4 }
   0xe   :  { %p363_p7 = pnand %p362_p6, %p356_p3 }
  0x10   :  { %366 = shalt.err (!%p363_p7)
}
  0x11   :  { %s440_s25 = smov 64   ;;  %s441_s26 = smov 4  }
  0x12   :  { %33 = dma.hbm_to_vmem [thread:$0]  %s535_s1, 256, %s28_s16, [#allocation6], %s440_s25, %s440_s25, %s441_s26  }
  0x13   :  { %s442_s29 = smov [#allocation2]   ;;  %s443_s5 = smov [#allocation7]  }
  0x14   :  { %s18_s30 = sshll.u32 %s442_s29, 4  ;;  %s39_s6 = sshll.u32 %s443_s5, 4  ;;  %s19_s30 = int_to_ptr.vmem [resolvable:$true] %s18_s30  ;;  %s40_s6 = int_to_ptr.vmem [resolvable:$true] %s39_s6 }
  0x15   :  { %s367_s9 = scalar_lea.hbm %s534_s0, 64 }
  0x16   :  { %p368_p8 = scmp.ne.s32.totalorder %s534_s0, %s367_s9  ;;  %p371_p9 = scmp.lt.u32.totalorder %s367_s9, %s534_s0 }
  0x18   :  { %p373_p10 = pnand %p371_p9, %p368_p8 }
  0x1a   :  { %376 = shalt.err (!%p373_p10)
}
  0x1b   :  { %s377_s1 = scalar_lea.vmem %s19_s30, 64  ;;  %p382_p12 = scmp.lt.s32.totalorder %s19_s30, %s19_s30 }
  0x1c   :  { %p378_p11 = scmp.ne.s32.totalorder %s19_s30, %s377_s1  ;;  %p383_p13 = scmp.lt.s32.totalorder %s377_s1, %s377_s1 }
  0x1e   :  { %p384_p0 = por %p383_p13, %p382_p12 }
  0x20   :  { %p385_p1 = pnand %p384_p0, %p378_p11 }
  0x22   :  { %388 = shalt.err (!%p385_p1)
}
  0x23   :  { %21 = dma.hbm_to_vmem [thread:$0]  %s534_s0, 64, %s19_s30, [#allocation3]  }
  0x24   :  { %s389_s18 = scalar_lea.hbm %s536_s2, 1024 }
  0x25   :  { %p390_p2 = scmp.ne.s32.totalorder %s536_s2, %s389_s18  ;;  %p393_p3 = scmp.lt.u32.totalorder %s389_s18, %s536_s2 }
  0x27   :  { %p395_p4 = pnand %p393_p3, %p390_p2 }
  0x29   :  { %398 = shalt.err (!%p395_p4)
}
  0x2a   :  { %s399_s23 = scalar_lea.vmem %s40_s6, 1024  ;;  %p404_p6 = scmp.lt.s32.totalorder %s40_s6, %s40_s6 }
  0x2b   :  { %p400_p5 = scmp.ne.s32.totalorder %s40_s6, %s399_s23  ;;  %p405_p7 = scmp.lt.s32.totalorder %s399_s23, %s399_s23 }
  0x2d   :  { %p406_p8 = por %p405_p7, %p404_p6 }
  0x2f   :  { %p407_p9 = pnand %p406_p8, %p400_p5 }
  0x31   :  { %410 = shalt.err (!%p407_p9)
}
  0x32   :  { %45 = dma.hbm_to_vmem [thread:$0]  %s536_s2, 1024, %s40_s6, [#allocation6], %s440_s25, %s440_s25, %s441_s26  }
  0x33   :  { %433 = dma.done.wait [#allocation3], 64  }
  0x34   :  { %434 = vsyncadd [#allocation3], 4294967232 }
  0x35   :  { %435 = dma.done.wait [#allocation6], 1280  }
  0x36   :  { %436 = vsyncadd [#allocation6], 4294966016  ;;  %v444_v0 = vmov 0.0   ;;  %vm445_vm0 = vmmov 0   ;;  %v331_v1 = vld [vmem:[#allocation5] sm:$0xff]   ;;  %v332_v2 = vld [vmem:[#allocation5 + $0x8] sm:$0xff]   ;;  %v239_v20 = vlaneseq }
  0x37   :  { %295 = vmatprep.subr.bf16.mxu0 %v444_v0  ;;  %299 = vmatprep.mubr.msk.bf16.mxu0 %vm445_vm0, %v444_v0  ;;  %v333_v3 = vld [vmem:[#allocation7] sm:$0xff]   ;;  %vm83_vm1 = vcmask 261120   ;;  %v334_v4 = vld [vmem:[#allocation7 + $0x8] sm:$0xff]   ;;  %v335_v6 = vld [vmem:[#allocation7 + $0x10] sm:$0xff]   ;;  %s446_s28 = smov [#allocation8]  }
  0x38   :  { %303 = vmatprep.subr.bf16.mxu1 %v444_v0  ;;  %319 = vmatprep.mubr.msk.bf16.mxu1 %vm445_vm0, %v444_v0  ;;  %v58_v5 = vld [vmem:[#allocation2] sm:$0xf]  ;;  %v336_v7 = vld [vmem:[#allocation7 + $0x18] sm:$0xff]   ;;  %v337_v8 = vld [vmem:[#allocation7 + $0x20] sm:$0xff]   ;;  %v240_v21 = vand.u32 127, %v239_v20  ;;  %s260_s29 = sshll.u32 %s446_s28, 4  ;;  %s261_s29 = int_to_ptr.vmem [resolvable:$true] %s260_s29 }
  0x39   :  { %296 = vmatpush3.bf16.msra.mxu0 %v331_v1  ;;  %304 = vmatpush3.bf16.msra.mxu1 %v333_v3  ;;  %v338_v9 = vld [vmem:[#allocation7 + $0x28] sm:$0xff]   ;;  %v339_v10 = vld [vmem:[#allocation7 + $0x30] sm:$0xff]   ;;  %v340_v11 = vld [vmem:[#allocation7 + $0x38] sm:$0xff]   ;;  %p416_p11 = scmp.lt.s32.totalorder %s261_s29, %s261_s29 }
  0x3a   :  { %297 = vmatprep.subr.bf16.mxu0 %v444_v0  ;;  %305 = vmatprep.subr.bf16.mxu1 %v444_v0  ;;  %v270_v12 = vld [vmem:[%s537_s3] ss:$0 sm:$0xff]  ;;  %v274_v22 = vld [vmem:[%s537_s3 + $0x1] ss:$0 sm:$0xff]  ;;  %vm241_vm2 = vcmp.lt.s32.totalorder %v240_v21, 8  ;;  %s411_s3 = scalar_lea.vmem %s261_s29, 128 }
  0x3b   :  { %p412_p10 = scmp.ne.s32.totalorder %s261_s29, %s411_s3  ;;  %p417_p12 = scmp.lt.s32.totalorder %s411_s3, %s411_s3 }
  0x3d   :  { %298 = vmatpush3.bf16.msra.mxu0 %v332_v2  ;;  %306 = vmatpush3.bf16.msra.mxu1 %v334_v4  ;;  %p418_p13 = por %p417_p12, %p416_p11 }
  0x3e   :  { %307 = vmatprep.subr.bf16.mxu1 %v444_v0 }
  0x3f   :  { %p419_p0 = pnand %p418_p13, %p412_p10 }
  0x40   :  { %300 = vmatmul.mubr.msk.bf16.vlgmr.msra.gmra.mrb[0].mxu0 %vm83_vm1, %v58_v5 }
  0x41   :  { %308 = vmatpush3.bf16.msra.mxu1 %v335_v6 }
  0x42   :  { %309 = vmatprep.subr.bf16.mxu1 %v444_v0 }
  0x45   :  { %310 = vmatpush3.bf16.msra.mxu1 %v336_v7 }
  0x46   :  { %311 = vmatprep.subr.bf16.mxu1 %v444_v0 }
  0x49   :  { %312 = vmatpush3.bf16.msra.mxu1 %v337_v8 }
  0x4a   :  { %313 = vmatprep.subr.bf16.mxu1 %v444_v0 }
  0x4d   :  { %314 = vmatpush3.bf16.msra.mxu1 %v338_v9 }
  0x4e   :  { %315 = vmatprep.subr.bf16.mxu1 %v444_v0 }
  0x51   :  { %316 = vmatpush3.bf16.msra.mxu1 %v339_v10 }
  0x52   :  { %317 = vmatprep.subr.bf16.mxu1 %v444_v0 }
  0x55   :  { %318 = vmatpush3.bf16.msra.mxu1 %v340_v11 }
 0x113   :  { %v121_v13 = vpop.f32.mrb[0].mxu0 }
 0x114   :  { %v122_v14 = vadd.f32 %v270_v12, %v121_v13  ;;  %v301_v15 = vpop.f32.mrb[1].mxu0 }
 0x115   :  { %v124_v16 = vpop.f32.mrb[2].mxu0 }
 0x116   :  { %v127_v17 = vmax.f32 %v122_v14, 0.0  ;;  %v302_v18 = vpop.f32.mrb[3].mxu0 }
 0x118   :  { %v128_v19 = vpack.c.bf16 %v127_v17, %v127_v17 }
 0x11a   :  { %320 = vmatmul.mubr.bf16.vlgmr.msra.gmra.mrb[0].mxu1 %v128_v19 }
 0x1ed   :  { %v233_v23 = vpop.f32.mrb[0].mxu1 }
 0x1ee   :  { %v234_v24 = vadd.f32 %v274_v22, %v233_v23  ;;  %v321_v25 = vpop.f32.mrb[1].mxu1 }
 0x1ef   :  { %v236_v26 = vpop.f32.mrb[2].mxu1 }
 0x1f0   :  { %v322_v27 = vpop.f32.mrb[3].mxu1  ;;  %v242_v28 = vsel %vm241_vm2, %v234_v24, -1e+30 }
 0x1f1   :  { %243 = vmax.xlane.f32.xlu0 %v242_v28 }
 0x27e   :  { %v244_v29 = vpop.xlane.xlu0 %243 }
 0x27f   :  { %v245_v30 = vsub.f32 %v242_v28, %v244_v29 }
 0x281   :  { %v246_v31 = vmul.f32 1.442695, %v245_v30 }
 0x283   :  { %341 = vpow2.f32 %v246_v31 }
 0x28d   :  { %v342_v32 = vpop.eup %341 }
 0x28e   :  { %248 = vadd.xlane.f32.xlu0 %v342_v32 }
 0x31b   :  { %v249_v33 = vpop.xlane.xlu0 %248 }
 0x31c   :  { %343 = vrcp.f32 %v249_v33 }
 0x326   :  { %v344_v34 = vpop.eup %343 }
 0x327   :  { %v251_v35 = vmul.f32 %v344_v34, %v342_v32 }
 0x329   :  { %v252_v36 = vsel %vm241_vm2, %v251_v35, %v234_v24 }
 0x32a   :  { %253 = vst [vmem:[#allocation8] sm:$0xff] %v252_v36 }
 0x32b   :  { %422 = shalt.err (!%p419_p0)
}
 0x32c   :  { %s423_s6 = scalar_lea.hbm %s538_s4, 128 }
 0x32d   :  { %p424_p1 = scmp.ne.s32.totalorder %s538_s4, %s423_s6  ;;  %p427_p2 = scmp.lt.u32.totalorder %s423_s6, %s538_s4 }
 0x32f   :  { %p429_p3 = pnand %p427_p2, %p424_p1 }
 0x331   :  { %432 = shalt.err (!%p429_p3)
}
 0x332   :  { %263 = dma.vmem_to_hbm [thread:$0]  %s261_s29, 128, %s538_s4, [#allocation4]  }
 0x333   :  { %437 = dma.done.wait [#allocation4], 128  }
 0x334   :  { %438 = vsyncadd [#allocation4], 4294967168 }
 0x335   :  { %267 = vsyncpa [#allocation3], 1 }
 0x336   :  { %268 = vsyncpa [#allocation6], 1 }
 0x337   :  { %269 = vsyncpa [#allocation4], 1 }

</bundles_post_ra>
